<compile_context>
chip_gen: v7x
topology: tpu7x:2x2x1
jax: 0.10.0
libtpu: 0.0.40
codegen_flags: <defaults>
</compile_context>

<pallas_src>
import functools

import jax
import jax.numpy as jnp
from jax.experimental import pallas as pl
from jax.experimental.pallas import tpu as pltpu

HIDDEN = 256
LANE = 128
SUB = 16  # bf16-friendly sublane multiple (harmless for f32)


def _round_up(x, m):
    return ((x + m - 1) // m) * m


# ---------------------------------------------------------------------------
# Kernel: fused 3-layer MLP on one batch tile.
# ---------------------------------------------------------------------------
def actor_mlp_kernel(x_ref, w1_ref, b1_ref, w2_ref, b2_ref, w3_ref, b3_ref,
                     out_ref):
    w_dtype = w1_ref.dtype

    # Layer 1: [tb, n_in] @ [n_in, 256] -> f32 acc; bias + ReLU stay f32 (VPU).
    x = x_ref[...].astype(w_dtype)  # cast next to the dot (no extra HBM pass)
    h = jnp.dot(x, w1_ref[...], preferred_element_type=jnp.float32)
    h = jnp.maximum(h + b1_ref[...], 0.0)

    # Layer 2: [tb, 256] @ [256, 256].
    h = jnp.dot(h.astype(w_dtype), w2_ref[...],
                preferred_element_type=jnp.float32)
    h = jnp.maximum(h + b2_ref[...], 0.0)

    # Output layer: [tb, 256] @ [256, n_act] + bias.
    o = jnp.dot(h.astype(w_dtype), w3_ref[...],
                preferred_element_type=jnp.float32)
    out_ref[...] = (o + b3_ref[...]).astype(out_ref.dtype)


# ---------------------------------------------------------------------------
# Tile / VMEM budgeting helpers.
# ---------------------------------------------------------------------------
def _vmem_tile_bytes(tb, n_in, n_act, w_itemsize):
    """Rough VMEM footprint of one pipelined grid step (bytes)."""
    x_buf = 2 * tb * _round_up(n_in, LANE) * 4        # double-buffered x (f32)
    o_buf = 2 * tb * _round_up(n_act, LANE) * 4       # double-buffered out (f32)
    w_buf = 2 * w_itemsize * (_round_up(n_in, SUB) * HIDDEN
                              + HIDDEN * HIDDEN
                              + HIDDEN * _round_up(n_act, LANE)
                              + 3 * HIDDEN)
    h_buf = 2 * tb * HIDDEN * 4                       # f32 intermediates
    return x_buf + o_buf + w_buf + h_buf


def _pick_tile(batch, block_b, n_in, n_act, w_itemsize):
    block_b = _round_up(max(block_b, SUB), SUB)
    tb = min(_round_up(batch, SUB), block_b)
    # v7x megacore: large batches must produce >= 2 tiles so the "parallel"
    # batch axis can be sharded across both TensorCores.
    if batch >= 512 and _round_up(batch, tb) // tb < 2:
        tb = _round_up((batch + 1) // 2, SUB)
    # VMEM back-off (v7x has 64 MiB physical; leave compiler headroom).
    budget = 40 * 1024 * 1024
    while tb > 256 and _vmem_tile_bytes(tb, n_in, n_act, w_itemsize) > budget:
        tb = max(256, _round_up(tb // 2, SUB))
    return tb


# ---------------------------------------------------------------------------
# Host wrapper.
# ---------------------------------------------------------------------------
@functools.partial(jax.jit, static_argnames=("block_b",))
def actor_forward(x, params, *, block_b=4096):
    """x: [B, n_inputs] float32.  params: from init_params()/prepare_params().

    Returns [B, n_actions] float32 (same semantics as the PyTorch Actor).
    """
    w1, b1 = params["w1"], params["b1"]
    w2, b2 = params["w2"], params["b2"]
    w3, b3 = params["w3"], params["b3"]

    B, n_in = x.shape
    n_act = w3.shape[1]
    w_itemsize = w1.dtype.itemsize

    tb = _pick_tile(B, block_b, n_in, n_act, w_itemsize)
    b_pad = _round_up(B, tb)
    if b_pad != B:
        x = jnp.pad(x, ((0, b_pad - B), (0, 0)))
    grid = (b_pad // tb,)

    def resident(a):
        # Constant index_map -> block stays VMEM-resident, no re-DMA per step.
        return pl.BlockSpec(a.shape, lambda i: (0,) * a.ndim)

    flops = 2 * b_pad * (n_in * HIDDEN + HIDDEN * HIDDEN + HIDDEN * n_act)
    bytes_accessed = int(
        b_pad * n_in * x.dtype.itemsize
        + sum(a.size * a.dtype.itemsize for a in (w1, b1, w2, b2, w3, b3))
        + b_pad * n_act * 4)

    vmem_limit = int(min(max(2 * _vmem_tile_bytes(tb, n_in, n_act, w_itemsize),
                             32 * 1024 * 1024),
                         64 * 1024 * 1024))

    out = pl.pallas_call(
        actor_mlp_kernel,
        out_shape=jax.ShapeDtypeStruct((b_pad, n_act), jnp.float32),
        grid=grid,
        in_specs=[
            pl.BlockSpec((tb, n_in), lambda i: (i, 0)),   # x: streamed per tile
            resident(w1), resident(b1),                   # weights/biases resident
            resident(w2), resident(b2),
            resident(w3), resident(b3),
        ],
        out_specs=pl.BlockSpec((tb, n_act), lambda i: (i, 0)),
        compiler_params=pltpu.CompilerParams(
            dimension_semantics=("parallel",),
            vmem_limit_bytes=vmem_limit),
        cost_estimate=pl.CostEstimate(
            flops=flops, transcendentals=0, bytes_accessed=bytes_accessed),
    )(x, w1, b1, w2, b2, w3, b3)

    return out if b_pad == B else out[:B]


def prepare_params(params, *, use_bf16=True):
    """One-time cast of weights to the MXU compute dtype (biases stay f32)."""
    dtype = jnp.bfloat16 if use_bf16 else jnp.float32
    prepped = {}
    for k in ("w1", "w2", "w3"):
        prepped[k] = params[k].astype(dtype)
    for k in ("b1", "b2", "b3"):
        prepped[k] = params[k].astype(jnp.float32)
    return prepped


def init_params(key, n_inputs, n_actions):
    """Deterministic init mimicking PyTorch nn.Linear default (uniform +-1/sqrt(fan_in))."""
    def linear(k, fan_in, fan_out):
        kw, kb = jax.random.split(k)
        bound = 1.0 / jnp.sqrt(jnp.float32(fan_in))
        w = jax.random.uniform(kw, (fan_in, fan_out), jnp.float32, -bound, bound)
        b = jax.random.uniform(kb, (1, fan_out), jnp.float32, -bound, bound)
        return w, b

    k1, k2, k3 = jax.random.split(key, 3)
    w1, b1 = linear(k1, n_inputs, HIDDEN)
    w2, b2 = linear(k2, HIDDEN, HIDDEN)
    w3, b3 = linear(k3, HIDDEN, n_actions)
    return {"w1": w1, "b1": b1, "w2": w2, "b2": b2, "w3": w3, "b3": b3}


def actor_forward_ref(x, params):
    h = jnp.maximum(x @ params["w1"] + params["b1"], 0.0)
    h = jnp.maximum(h @ params["w2"] + params["b2"], 0.0)
    return h @ params["w3"] + params["b3"]


if __name__ == "__main__":
    # Hopper-v3: observation dim = 11, action dim = 3.
    n_inputs, n_actions = 11, 3

    key = jax.random.PRNGKey(0)
    k_params, k_x1, k_x2 = jax.random.split(key, 3)
    params = init_params(k_params, n_inputs, n_actions)
    params_f32 = prepare_params(params, use_bf16=False)
    params_bf16 = prepare_params(params, use_bf16=True)

    # --- small deployed-size batch, exact f32 path: tight check ---
    x_small = jax.random.normal(k_x1, (8, n_inputs), jnp.float32)
    out_f32 = jax.block_until_ready(actor_forward(x_small, params_f32))
    ref_small = actor_forward_ref(x_small, params)
    assert out_f32.shape == (8, n_actions)
    assert jnp.allclose(out_f32, ref_small, atol=1e-5, rtol=1e-5), \
        "f32 kernel mismatch vs JAX reference"

    # --- larger, non-multiple batch exercising the tiled grid ---
    x_big = jax.random.normal(k_x2, (300, n_inputs), jnp.float32)
    ref_big = actor_forward_ref(x_big, params)

    out_big_f32 = jax.block_until_ready(
        actor_forward(x_big, params_f32, block_b=128))
    assert out_big_f32.shape == (300, n_actions)
    assert jnp.allclose(out_big_f32, ref_big, atol=1e-5, rtol=1e-5), \
        "tiled f32 kernel mismatch vs JAX reference"

    # --- bf16 MXU path (deployed default on all generations) ---
    out_big_bf16 = jax.block_until_ready(
        actor_forward(x_big, params_bf16, block_b=128))
    assert out_big_bf16.shape == (300, n_actions)
    assert jnp.allclose(out_big_bf16, ref_big, atol=1e-1, rtol=5e-2), \
        "bf16 kernel mismatch vs JAX reference"

    # --- default large-tile path (block_b=4096) ---
    out_def = jax.block_until_ready(actor_forward(x_big, params_bf16))
    assert out_def.shape == (300, n_actions)
    assert jnp.allclose(out_def, ref_big, atol=1e-1, rtol=5e-2), \
        "default-tile bf16 kernel mismatch vs JAX reference"

    print("KERNEL_OK")
</pallas_src>

<mosaic_0001>
module attributes {stable_mosaic.version = 11 : i64} {
  func.func @actor_mlp_kernel(%arg0: i32, %arg1: memref<16x11xf32, #tpu.memory_space<vmem>>, %arg2: memref<11x256xf32, #tpu.memory_space<vmem>>, %arg3: memref<1x256xf32, #tpu.memory_space<vmem>>, %arg4: memref<256x256xf32, #tpu.memory_space<vmem>>, %arg5: memref<1x256xf32, #tpu.memory_space<vmem>>, %arg6: memref<256x3xf32, #tpu.memory_space<vmem>>, %arg7: memref<1x3xf32, #tpu.memory_space<vmem>>, %arg8: memref<16x3xf32, #tpu.memory_space<vmem>>) attributes {dimension_semantics = [#tpu.dimension_semantics<parallel>], iteration_bounds = array<i64: 1>, scalar_prefetch = 0 : i64, scratch_operands = 0 : i64, tpu.core_type = #tpu.core_type<tc>, window_params = [{transform_indices = @transform_0, window_bounds = array<i64: 16, 11>}, {pipeline_mode = #tpu.pipeline_mode<synchronous>, transform_indices = @transform_1, window_bounds = array<i64: 11, 256>}, {pipeline_mode = #tpu.pipeline_mode<synchronous>, transform_indices = @transform_2, window_bounds = array<i64: 1, 256>}, {pipeline_mode = #tpu.pipeline_mode<synchronous>, transform_indices = @transform_3, window_bounds = array<i64: 256, 256>}, {pipeline_mode = #tpu.pipeline_mode<synchronous>, transform_indices = @transform_4, window_bounds = array<i64: 1, 256>}, {pipeline_mode = #tpu.pipeline_mode<synchronous>, transform_indices = @transform_5, window_bounds = array<i64: 256, 3>}, {pipeline_mode = #tpu.pipeline_mode<synchronous>, transform_indices = @transform_6, window_bounds = array<i64: 1, 3>}, {transform_indices = @transform_7, window_bounds = array<i64: 16, 3>}]} {
    %c0 = arith.constant 0 : index
    %c0_0 = arith.constant 0 : index
    %0 = vector.load %arg1[%c0, %c0_0] : memref<16x11xf32, #tpu.memory_space<vmem>>, vector<16x11xf32>
    %c0_1 = arith.constant 0 : index
    %c0_2 = arith.constant 0 : index
    %1 = vector.load %arg2[%c0_1, %c0_2] : memref<11x256xf32, #tpu.memory_space<vmem>>, vector<11x256xf32>
    %cst = arith.constant dense<0.000000e+00> : vector<16x256xf32>
    %2 = tpu.matmul %0, %1, %cst {dimension_numbers = #tpu.dot_dimension_numbers<[1], [0], [0], [1], [0, 0, 1, 1], [], []>} : vector<16x11xf32>, vector<11x256xf32>, vector<16x256xf32> -> vector<16x256xf32>
    %c0_3 = arith.constant 0 : index
    %c0_4 = arith.constant 0 : index
    %3 = vector.load %arg3[%c0_3, %c0_4] : memref<1x256xf32, #tpu.memory_space<vmem>>, vector<1x256xf32>
    %4 = vector.broadcast %3 : vector<1x256xf32> to vector<16x256xf32>
    %5 = arith.addf %2, %4 : vector<16x256xf32>
    %cst_5 = arith.constant 0.000000e+00 : f32
    %6 = vector.broadcast %cst_5 : f32 to vector<16x256xf32>
    %7 = arith.maximumf %5, %6 : vector<16x256xf32>
    %c0_6 = arith.constant 0 : index
    %c0_7 = arith.constant 0 : index
    %8 = vector.load %arg4[%c0_6, %c0_7] : memref<256x256xf32, #tpu.memory_space<vmem>>, vector<256x256xf32>
    %cst_8 = arith.constant dense<0.000000e+00> : vector<16x256xf32>
    %9 = tpu.matmul %7, %8, %cst_8 {dimension_numbers = #tpu.dot_dimension_numbers<[1], [0], [0], [1], [0, 0, 1, 1], [], []>} : vector<16x256xf32>, vector<256x256xf32>, vector<16x256xf32> -> vector<16x256xf32>
    %c0_9 = arith.constant 0 : index
    %c0_10 = arith.constant 0 : index
    %10 = vector.load %arg5[%c0_9, %c0_10] : memref<1x256xf32, #tpu.memory_space<vmem>>, vector<1x256xf32>
    %11 = vector.broadcast %10 : vector<1x256xf32> to vector<16x256xf32>
    %12 = arith.addf %9, %11 : vector<16x256xf32>
    %cst_11 = arith.constant 0.000000e+00 : f32
    %13 = vector.broadcast %cst_11 : f32 to vector<16x256xf32>
    %14 = arith.maximumf %12, %13 : vector<16x256xf32>
    %c0_12 = arith.constant 0 : index
    %c0_13 = arith.constant 0 : index
    %15 = vector.load %arg6[%c0_12, %c0_13] : memref<256x3xf32, #tpu.memory_space<vmem>>, vector<256x3xf32>
    %cst_14 = arith.constant dense<0.000000e+00> : vector<16x3xf32>
    %16 = tpu.matmul %14, %15, %cst_14 {dimension_numbers = #tpu.dot_dimension_numbers<[1], [0], [0], [1], [0, 0, 1, 1], [], []>} : vector<16x256xf32>, vector<256x3xf32>, vector<16x3xf32> -> vector<16x3xf32>
    %c0_15 = arith.constant 0 : index
    %c0_16 = arith.constant 0 : index
    %17 = vector.load %arg7[%c0_15, %c0_16] : memref<1x3xf32, #tpu.memory_space<vmem>>, vector<1x3xf32>
    %18 = vector.broadcast %17 : vector<1x3xf32> to vector<16x3xf32>
    %19 = arith.addf %16, %18 : vector<16x3xf32>
    %c0_17 = arith.constant 0 : index
    %c0_18 = arith.constant 0 : index
    %20 = vector.load %arg8[%c0_17, %c0_18] : memref<16x3xf32, #tpu.memory_space<vmem>>, vector<16x3xf32>
    tpu.vector_store %arg8[%c0_17, %c0_18], %19 {strides = array<i32>} : memref<16x3xf32, #tpu.memory_space<vmem>>, vector<16x3xf32>,
    return
  }
  func.func @transform_0(%arg0: i32) -> (i32, i32) {
    %c0_i32 = arith.constant 0 : i32
    %c0_i32_0 = arith.constant 0 : i32
    return %arg0, %c0_i32 : i32, i32
  }
  func.func @transform_1(%arg0: i32) -> (i32, i32) {
    %c0_i32 = arith.constant 0 : i32
    %c0_i32_0 = arith.constant 0 : i32
    %c0_i32_1 = arith.constant 0 : i32
    return %c0_i32, %c0_i32_0 : i32, i32
  }
  func.func @transform_2(%arg0: i32) -> (i32, i32) {
    %c0_i32 = arith.constant 0 : i32
    %c0_i32_0 = arith.constant 0 : i32
    %c0_i32_1 = arith.constant 0 : i32
    return %c0_i32, %c0_i32_0 : i32, i32
  }
  func.func @transform_3(%arg0: i32) -> (i32, i32) {
    %c0_i32 = arith.constant 0 : i32
    %c0_i32_0 = arith.constant 0 : i32
    %c0_i32_1 = arith.constant 0 : i32
    return %c0_i32, %c0_i32_0 : i32, i32
  }
  func.func @transform_4(%arg0: i32) -> (i32, i32) {
    %c0_i32 = arith.constant 0 : i32
    %c0_i32_0 = arith.constant 0 : i32
    %c0_i32_1 = arith.constant 0 : i32
    return %c0_i32, %c0_i32_0 : i32, i32
  }
  func.func @transform_5(%arg0: i32) -> (i32, i32) {
    %c0_i32 = arith.constant 0 : i32
    %c0_i32_0 = arith.constant 0 : i32
    %c0_i32_1 = arith.constant 0 : i32
    return %c0_i32, %c0_i32_0 : i32, i32
  }
  func.func @transform_6(%arg0: i32) -> (i32, i32) {
    %c0_i32 = arith.constant 0 : i32
    %c0_i32_0 = arith.constant 0 : i32
    %c0_i32_1 = arith.constant 0 : i32
    return %c0_i32, %c0_i32_0 : i32, i32
  }
  func.func @transform_7(%arg0: i32) -> (i32, i32) {
    %c0_i32 = arith.constant 0 : i32
    %c0_i32_0 = arith.constant 0 : i32
    return %arg0, %c0_i32 : i32, i32
  }
}

</mosaic_0001>

<bundles_post_ra>
// kernel: actor_forward.1
= control target key start
LH: loop header
LB: loop body
LE: loop exit
PB: predicated region body
PF: predicated region fallthrough
CT: control target
= control target key end

     0   :  { %12 = vsyncpa [#allocation3], 0  ;;  %s606_s24 = smov [#allocation2]   ;;  %s802_s0 = inlined_call_operand.vmem [shape: f32[16,11], index: 0, kind: input, shape index: {}]   ;;  %s803_s1 = inlined_call_operand.vmem [shape: f32[11,256], index: 1, kind: input, shape index: {}]   ;;  %s804_s2 = inlined_call_operand.vmem [shape: f32[1,256], index: 2, kind: input, shape index: {}]   ;;  %s805_s3 = inlined_call_operand.hbm [shape: f32[256,256], index: 3, kind: input, shape index: {}]   ;;  %s806_s4 = inlined_call_operand.vmem [shape: f32[1,256], index: 4, kind: input, shape index: {}]   ;;  %s807_s5 = inlined_call_operand.vmem [shape: f32[256,3], index: 5, kind: input, shape index: {}]   ;;  %s808_s6 = inlined_call_operand.vmem [shape: f32[1,3], index: 6, kind: input, shape index: {}]   ;;  %s809_s7 = inlined_call_operand.vmem [shape: f32[16,3], index: 7, kind: output, shape index: {}]  }
   0x1   :  { %s24_s25 = sshll.u32 %s606_s24, 4  ;;  %s582_s28 = scalar_lea.hbm %s805_s3, 8192  ;;  %s25_s25 = int_to_ptr.vmem [resolvable:$true] %s24_s25 }
   0x2   :  { %p583_p0 = scmp.ne.s32.totalorder %s805_s3, %s582_s28  ;;  %p586_p1 = scmp.lt.u32.totalorder %s582_s28, %s805_s3 }
   0x4   :  { %p588_p2 = pnand %p586_p1, %p583_p0 }
   0x6   :  { %591 = shalt.err (!%p588_p2)
}
   0x7   :  { %s592_s10 = scalar_lea.vmem %s25_s25, 8192  ;;  %p597_p4 = scmp.lt.s32.totalorder %s25_s25, %s25_s25 }
   0x8   :  { %p593_p3 = scmp.ne.s32.totalorder %s25_s25, %s592_s10  ;;  %p598_p5 = scmp.lt.s32.totalorder %s592_s10, %s592_s10 }
   0xa   :  { %p599_p6 = por %p598_p5, %p597_p4 }
   0xc   :  { %p600_p7 = pnand %p599_p6, %p593_p3 }
   0xe   :  { %603 = shalt.err (!%p600_p7)
}
   0xf   :  { %s607_s11 = smov 256   ;;  %s608_s12 = smov 16  }
  0x10   :  { %30 = dma.hbm_to_vmem [thread:$0]  %s805_s3, 8192, %s25_s25, [#allocation3], %s607_s11, %s607_s11, %s608_s12  }
  0x11   :  { %604 = dma.done.wait [#allocation3], 8192  }
  0x12   :  { %605 = vsyncadd [#allocation3], 4294959104  ;;  %v609_v0 = vmov 0.0   ;;  %vm65_vm0 = vcmask 1042432   ;;  %vm610_vm1 = vmmov 1   ;;  %v43_v2 = vld [vmem:[%s803_s1 + $0x8] sm:$0xff] }
  0x13   :  { %136 = vmatprep.mubr.f32.mxu0 %v609_v0  ;;  %vm663_vm2 = vmpackc.low %vm65_vm0, %vm610_vm1  ;;  %v45_v3 = vld [vmem:[%s803_s1 + $0x18] sm:$0x7]  ;;  %v42_v4 = vld [vmem:[%s803_s1] sm:$0xff]  ;;  %vm58_vm3 = vcmask 89088   ;;  %vm424_vm4 = vcmask 23552  }
  0x14   :  { %v475_v5 = vpack.c.bf16 %v45_v3, %v43_v2  ;;  %v44_v6 = vld [vmem:[%s803_s1 + $0x10] sm:$0x7]  ;;  %v40_v8 = vld [vmem:[%s802_s0] sm:$0xff]  ;;  %v154_v9 = vld [vmem:[#allocation2 + $0x8] sm:$0xff] }
  0x15   :  { %v478_v7 = vpack.c.bf16 %v44_v6, %v42_v4  ;;  %v156_v10 = vld [vmem:[#allocation2 + $0x18] sm:$0xff]  ;;  %v153_v11 = vld [vmem:[#allocation2] sm:$0xff]  ;;  %v155_v13 = vld [vmem:[#allocation2 + $0x10] sm:$0xff] }
  0x16   :  { %477 = vmatprep.subr.msk.bf16.mxu0 %vm663_vm2, %v475_v5  ;;  %v481_v12 = vpack.c.bf16 %v156_v10, %v154_v9  ;;  %v158_v14 = vld [vmem:[#allocation2 + $0x28] sm:$0xff]  ;;  %v160_v15 = vld [vmem:[#allocation2 + $0x38] sm:$0xff]  ;;  %v483_v16 = vpack.c.bf16 %v155_v13, %v153_v11  ;;  %v157_v18 = vld [vmem:[#allocation2 + $0x20] sm:$0xff] }
  0x17   :  { %480 = vmatpush1.bf16.msk.msra.mxu0 %vm663_vm2, %v478_v7  ;;  %v485_v17 = vpack.c.bf16 %v160_v15, %v158_v14  ;;  %v159_v19 = vld [vmem:[#allocation2 + $0x30] sm:$0xff]  ;;  %v162_v20 = vld [vmem:[#allocation2 + $0x48] sm:$0xff]  ;;  %v164_v21 = vld [vmem:[#allocation2 + $0x58] sm:$0xff] }
  0x18   :  { %482 = vmatprep.subr.bf16.mxu1 %v481_v12  ;;  %v487_v22 = vpack.c.bf16 %v159_v19, %v157_v18  ;;  %v489_v23 = vpack.c.bf16 %v164_v21, %v162_v20  ;;  %v161_v24 = vld [vmem:[#allocation2 + $0x40] sm:$0xff]  ;;  %v163_v25 = vld [vmem:[#allocation2 + $0x50] sm:$0xff]  ;;  %v41_v26 = vld [vmem:[%s802_s0 + $0x8] sm:$0xff] }
  0x19   :  { %484 = vmatpush1.bf16.msra.mxu1 %v483_v16  ;;  %v166_v27 = vld [vmem:[#allocation2 + $0x68] sm:$0xff]  ;;  %v168_v28 = vld [vmem:[#allocation2 + $0x78] sm:$0xff]  ;;  %v491_v29 = vpack.c.bf16 %v163_v25, %v161_v24  ;;  %v165_v31 = vld [vmem:[#allocation2 + $0x60] sm:$0xff] }
  0x1a   :  { %434 = vmatmul.mubr.msk.f32.vlgmr.msra.gmra.mrb[0].mxu0 %vm58_vm3, %v40_v8  ;;  %486 = vmatprep.subr.bf16.mxu1 %v485_v17  ;;  %v493_v30 = vpack.c.bf16 %v168_v28, %v166_v27  ;;  %v167_v32 = vld [vmem:[#allocation2 + $0x70] sm:$0xff]  ;;  %v170_v33 = vld [vmem:[#allocation2 + $0x88] sm:$0xff]  ;;  %v172_v34 = vld [vmem:[#allocation2 + $0x98] sm:$0xff] }
  0x1b   :  { %142 = vmatprep.mubr.f32.mxu0 %v609_v0  ;;  %v495_v35 = vpack.c.bf16 %v167_v32, %v165_v31  ;;  %v497_v36 = vpack.c.bf16 %v172_v34, %v170_v33  ;;  %v169_v37 = vld [vmem:[#allocation2 + $0x80] sm:$0xff]  ;;  %v171_v38 = vld [vmem:[#allocation2 + $0x90] sm:$0xff]  ;;  %v174_v39 = vld [vmem:[#allocation2 + $0xa8] sm:$0xff] }
  0x1c   :  { %v176_v40 = vld [vmem:[#allocation2 + $0xb8] sm:$0xff]  ;;  %v499_v41 = vpack.c.bf16 %v171_v38, %v169_v37  ;;  %v173_v43 = vld [vmem:[#allocation2 + $0xa0] sm:$0xff]  ;;  %v175_v44 = vld [vmem:[#allocation2 + $0xb0] sm:$0xff] }
  0x1d   :  { %488 = vmatpush1.bf16.msra.mxu1 %v487_v22  ;;  %v501_v42 = vpack.c.bf16 %v176_v40, %v174_v39  ;;  %v178_v45 = vld [vmem:[#allocation2 + $0xc8] sm:$0xff]  ;;  %v180_v46 = vld [vmem:[#allocation2 + $0xd8] sm:$0xff]  ;;  %v503_v47 = vpack.c.bf16 %v175_v44, %v173_v43  ;;  %v177_v49 = vld [vmem:[#allocation2 + $0xc0] sm:$0xff] }
  0x1e   :  { %435 = vmatmul.mubr.msk.f32.gmra.mrb[2].mxu0 %vm58_vm3, %v41_v26  ;;  %490 = vmatprep.subr.bf16.mxu1 %v489_v23  ;;  %v505_v48 = vpack.c.bf16 %v180_v46, %v178_v45  ;;  %v179_v50 = vld [vmem:[#allocation2 + $0xd0] sm:$0xff]  ;;  %v182_v51 = vld [vmem:[#allocation2 + $0xe8] sm:$0xff]  ;;  %v184_v52 = vld [vmem:[#allocation2 + $0xf8] sm:$0xff] }
  0x1f   :  { %v507_v53 = vpack.c.bf16 %v179_v50, %v177_v49  ;;  %v509_v54 = vpack.c.bf16 %v184_v52, %v182_v51  ;;  %v181_v55 = vld [vmem:[#allocation2 + $0xe0] sm:$0xff]  ;;  %v183_v56 = vld [vmem:[#allocation2 + $0xf0] sm:$0xff]  ;;  %v186_v57 = vld [vmem:[#allocation2 + $0x108] sm:$0xff] }
  0x20   :  { %v188_v58 = vld [vmem:[#allocation2 + $0x118] sm:$0xff]  ;;  %v511_v59 = vpack.c.bf16 %v183_v56, %v181_v55  ;;  %v185_v61 = vld [vmem:[#allocation2 + $0x100] sm:$0xff]  ;;  %v187_v62 = vld [vmem:[#allocation2 + $0x110] sm:$0xff] }
  0x21   :  { %492 = vmatpush1.bf16.msra.mxu1 %v491_v29  ;;  %v513_v60 = vpack.c.bf16 %v188_v58, %v186_v57  ;;  %v190_v63 = vld [vmem:[#allocation2 + $0x128] sm:$0xff]  ;;  %v192_v0 = vld [vmem:[#allocation2 + $0x138] sm:$0xff]  ;;  %v515_v1 = vpack.c.bf16 %v187_v62, %v185_v61  ;;  %v189_v3 = vld [vmem:[#allocation2 + $0x120] sm:$0xff] }
  0x22   :  { %494 = vmatprep.subr.bf16.mxu1 %v493_v30  ;;  %v517_v2 = vpack.c.bf16 %v192_v0, %v190_v63  ;;  %v191_v4 = vld [vmem:[#allocation2 + $0x130] sm:$0xff]  ;;  %v194_v5 = vld [vmem:[#allocation2 + $0x148] sm:$0xff]  ;;  %v196_v6 = vld [vmem:[#allocation2 + $0x158] sm:$0xff] }
  0x23   :  { %v519_v7 = vpack.c.bf16 %v191_v4, %v189_v3  ;;  %v521_v8 = vpack.c.bf16 %v196_v6, %v194_v5  ;;  %v193_v9 = vld [vmem:[#allocation2 + $0x140] sm:$0xff]  ;;  %v195_v10 = vld [vmem:[#allocation2 + $0x150] sm:$0xff]  ;;  %v198_v11 = vld [vmem:[#allocation2 + $0x168] sm:$0xff] }
  0x24   :  { %v200_v12 = vld [vmem:[#allocation2 + $0x178] sm:$0xff]  ;;  %v523_v13 = vpack.c.bf16 %v195_v10, %v193_v9  ;;  %v197_v15 = vld [vmem:[#allocation2 + $0x160] sm:$0xff]  ;;  %v199_v16 = vld [vmem:[#allocation2 + $0x170] sm:$0xff] }
  0x25   :  { %496 = vmatpush1.bf16.msra.mxu1 %v495_v35  ;;  %v525_v14 = vpack.c.bf16 %v200_v12, %v198_v11  ;;  %v202_v17 = vld [vmem:[#allocation2 + $0x188] sm:$0xff]  ;;  %v204_v18 = vld [vmem:[#allocation2 + $0x198] sm:$0xff]  ;;  %v527_v19 = vpack.c.bf16 %v199_v16, %v197_v15  ;;  %v201_v21 = vld [vmem:[#allocation2 + $0x180] sm:$0xff] }
  0x26   :  { %498 = vmatprep.subr.bf16.mxu1 %v497_v36  ;;  %v529_v20 = vpack.c.bf16 %v204_v18, %v202_v17  ;;  %v203_v22 = vld [vmem:[#allocation2 + $0x190] sm:$0xff]  ;;  %v206_v23 = vld [vmem:[#allocation2 + $0x1a8] sm:$0xff]  ;;  %v208_v24 = vld [vmem:[#allocation2 + $0x1b8] sm:$0xff]  ;;  %v48_v17 = vlaneseq }
  0x27   :  { %v531_v25 = vpack.c.bf16 %v203_v22, %v201_v21  ;;  %v533_v26 = vpack.c.bf16 %v208_v24, %v206_v23  ;;  %v205_v27 = vld [vmem:[#allocation2 + $0x1a0] sm:$0xff]  ;;  %v207_v28 = vld [vmem:[#allocation2 + $0x1b0] sm:$0xff]  ;;  %v210_v29 = vld [vmem:[#allocation2 + $0x1c8] sm:$0xff] }
  0x28   :  { %v212_v30 = vld [vmem:[#allocation2 + $0x1d8] sm:$0xff]  ;;  %v535_v31 = vpack.c.bf16 %v207_v28, %v205_v27  ;;  %v209_v33 = vld [vmem:[#allocation2 + $0x1c0] sm:$0xff]  ;;  %v211_v34 = vld [vmem:[#allocation2 + $0x1d0] sm:$0xff]  ;;  %v49_v18 = vshrl.u32 %v48_v17, 7 }
  0x29   :  { %500 = vmatpush1.bf16.msra.mxu1 %v499_v41  ;;  %v537_v32 = vpack.c.bf16 %v212_v30, %v210_v29  ;;  %v539_v35 = vpack.c.bf16 %v211_v34, %v209_v33  ;;  %v214_v36 = vld [vmem:[#allocation2 + $0x1e8] sm:$0xff]  ;;  %v216_v37 = vld [vmem:[#allocation2 + $0x1f8] sm:$0xff]  ;;  %v213_v39 = vld [vmem:[#allocation2 + $0x1e0] sm:$0xff] }
  0x2a   :  { %502 = vmatprep.subr.bf16.mxu1 %v501_v42  ;;  %v541_v38 = vpack.c.bf16 %v216_v37, %v214_v36  ;;  %v215_v40 = vld [vmem:[#allocation2 + $0x1f0] sm:$0xff]  ;;  %v326_v42 = vld [vmem:[%s807_s5 + $0x80] sm:$0xff]  ;;  %v327_v43 = vld [vmem:[%s807_s5 + $0x88] sm:$0xff]  ;;  %v54_v21 = vsub.s32 1, %v49_v18 }
  0x2b   :  { %v543_v41 = vpack.c.bf16 %v215_v40, %v213_v39  ;;  %v310_v44 = vld [vmem:[%s807_s5] sm:$0xff]  ;;  %v545_v45 = vpack.c.bf16 %v327_v43, %v326_v42  ;;  %v311_v46 = vld [vmem:[%s807_s5 + $0x8] sm:$0xff]  ;;  %v312_v51 = vld [vmem:[%s807_s5 + $0x10] sm:$0xff] }
  0x2c   :  { %v547_v49 = vpack.c.bf16 %v311_v46, %v310_v44  ;;  %v313_v52 = vld [vmem:[%s807_s5 + $0x18] sm:$0xff]  ;;  %v314_v57 = vld [vmem:[%s807_s5 + $0x20] sm:$0xff]  ;;  %v315_v58 = vld [vmem:[%s807_s5 + $0x28] sm:$0xff] }
  0x2d   :  { %504 = vmatpush1.bf16.msra.mxu1 %v503_v47  ;;  %v328_v47 = vld [vmem:[%s807_s5 + $0x90] sm:$0xff]  ;;  %546 = vmatprep.subr.bf16.mxu0 %v545_v45  ;;  %v551_v55 = vpack.c.bf16 %v313_v52, %v312_v51  ;;  %v555_v61 = vpack.c.bf16 %v315_v58, %v314_v57  ;;  %v317_v0 = vld [vmem:[%s807_s5 + $0x38] sm:$0xff]  ;;  %v318_v5 = vld [vmem:[%s807_s5 + $0x40] sm:$0xff] }
  0x2e   :  { %506 = vmatprep.subr.bf16.mxu1 %v505_v48  ;;  %v329_v48 = vld [vmem:[%s807_s5 + $0x98] sm:$0xff]  ;;  %548 = vmatpush3.bf16.msra.mxu0 %v547_v49  ;;  %v316_v63 = vld [vmem:[%s807_s5 + $0x30] sm:$0xff]  ;;  %v319_v6 = vld [vmem:[%s807_s5 + $0x48] sm:$0xff] }
  0x2f   :  { %v549_v50 = vpack.c.bf16 %v329_v48, %v328_v47  ;;  %v559_v3 = vpack.c.bf16 %v317_v0, %v316_v63  ;;  %v563_v9 = vpack.c.bf16 %v319_v6, %v318_v5  ;;  %v320_v11 = vld [vmem:[%s807_s5 + $0x50] sm:$0xff]  ;;  %v321_v12 = vld [vmem:[%s807_s5 + $0x58] sm:$0xff]  ;;  %v322_v36 = vld [vmem:[%s807_s5 + $0x60] sm:$0xff] }
  0x30   :  { %v567_v15 = vpack.c.bf16 %v321_v12, %v320_v11  ;;  %v323_v37 = vld [vmem:[%s807_s5 + $0x68] sm:$0xff]  ;;  %v340_v39 = vld [vmem:[%s807_s5 + $0xf0] sm:$0xff]  ;;  %v341_v40 = vld [vmem:[%s807_s5 + $0xf8] sm:$0xff] }
  0x31   :  { %508 = vmatpush1.bf16.msra.mxu1 %v507_v53  ;;  %v330_v53 = vld [vmem:[%s807_s5 + $0xa0] sm:$0xff]  ;;  %550 = vmatprep.subr.bf16.mxu0 %v549_v50  ;;  %v324_v42 = vld [vmem:[%s807_s5 + $0x70] sm:$0xff]  ;;  %v325_v43 = vld [vmem:[%s807_s5 + $0x78] sm:$0xff] }
  0x32   :  { %510 = vmatprep.subr.bf16.mxu1 %v509_v54  ;;  %v331_v54 = vld [vmem:[%s807_s5 + $0xa8] sm:$0xff]  ;;  %552 = vmatpush3.bf16.msra.mxu0 %v551_v55  ;;  %v575_v44 = vpack.c.bf16 %v325_v43, %v324_v42  ;;  %v217_v45 = vld [vmem:[%s806_s4] sm:$0x3] }
  0x33   :  { %v553_v56 = vpack.c.bf16 %v331_v54, %v330_v53  ;;  %v226_v47 = vrot.slane %v217_v45, %v54_v21 }
  0x35   :  { %512 = vmatpush1.bf16.msra.mxu1 %v511_v59  ;;  %v332_v59 = vld [vmem:[%s807_s5 + $0xb0] sm:$0xff]  ;;  %554 = vmatprep.subr.bf16.mxu0 %v553_v56 }
  0x36   :  { %514 = vmatprep.subr.bf16.mxu1 %v513_v60  ;;  %v333_v60 = vld [vmem:[%s807_s5 + $0xb8] sm:$0xff]  ;;  %556 = vmatpush3.bf16.msra.mxu0 %v555_v61  ;;  %v436_v61 = vld [vmem:[%s808_s6] ss:$0 sm:$0xff] }
  0x37   :  { %v557_v62 = vpack.c.bf16 %v333_v60, %v332_v59 }
  0x39   :  { %516 = vmatpush1.bf16.msra.mxu1 %v515_v1  ;;  %v334_v1 = vld [vmem:[%s807_s5 + $0xc0] sm:$0xff]  ;;  %558 = vmatprep.subr.bf16.mxu0 %v557_v62 }
  0x3a   :  { %518 = vmatprep.subr.bf16.mxu1 %v517_v2  ;;  %v335_v2 = vld [vmem:[%s807_s5 + $0xc8] sm:$0xff]  ;;  %560 = vmatpush3.bf16.msra.mxu0 %v559_v3 }
  0x3b   :  { %v561_v4 = vpack.c.bf16 %v335_v2, %v334_v1 }
  0x3d   :  { %520 = vmatpush1.bf16.msra.mxu1 %v519_v7  ;;  %v336_v7 = vld [vmem:[%s807_s5 + $0xd0] sm:$0xff]  ;;  %562 = vmatprep.subr.bf16.mxu0 %v561_v4 }
  0x3e   :  { %522 = vmatprep.subr.bf16.mxu1 %v521_v8  ;;  %v337_v8 = vld [vmem:[%s807_s5 + $0xd8] sm:$0xff]  ;;  %564 = vmatpush3.bf16.msra.mxu0 %v563_v9 }
  0x3f   :  { %v565_v10 = vpack.c.bf16 %v337_v8, %v336_v7 }
  0x41   :  { %524 = vmatpush1.bf16.msra.mxu1 %v523_v13  ;;  %v338_v13 = vld [vmem:[%s807_s5 + $0xe0] sm:$0xff]  ;;  %566 = vmatprep.subr.bf16.mxu0 %v565_v10 }
  0x42   :  { %526 = vmatprep.subr.bf16.mxu1 %v525_v14  ;;  %v339_v14 = vld [vmem:[%s807_s5 + $0xe8] sm:$0xff]  ;;  %568 = vmatpush3.bf16.msra.mxu0 %v567_v15 }
  0x43   :  { %v569_v16 = vpack.c.bf16 %v339_v14, %v338_v13 }
  0x45   :  { %528 = vmatpush1.bf16.msra.mxu1 %v527_v19  ;;  %570 = vmatprep.subr.bf16.mxu0 %v569_v16  ;;  %v50_v19 = vsub.s32 0, %v49_v18 }
  0x46   :  { %530 = vmatprep.subr.bf16.mxu1 %v529_v20  ;;  %v46_v20 = vld [vmem:[%s804_s2] sm:$0x3] }
  0x47   :  { %v51_v22 = vrot.slane %v46_v20, %v50_v19  ;;  %v55_v23 = vrot.slane %v46_v20, %v54_v21  ;;  %v222_v46 = vrot.slane %v217_v45, %v50_v19 }
  0x49   :  { %532 = vmatpush1.bf16.msra.mxu1 %v531_v25 }
  0x4a   :  { %534 = vmatprep.subr.bf16.mxu1 %v533_v26 }
  0x4d   :  { %536 = vmatpush1.bf16.msra.mxu1 %v535_v31 }
  0x4e   :  { %538 = vmatprep.subr.bf16.mxu1 %v537_v32 }
  0x51   :  { %540 = vmatpush1.bf16.msra.mxu1 %v539_v35 }
  0x52   :  { %542 = vmatprep.subr.bf16.mxu1 %v541_v38  ;;  %v571_v38 = vpack.c.bf16 %v323_v37, %v322_v36 }
  0x54   :  { %572 = vmatpush3.bf16.msra.mxu0 %v571_v38 }
  0x55   :  { %544 = vmatpush1.bf16.msra.mxu1 %v543_v41  ;;  %v573_v41 = vpack.c.bf16 %v341_v40, %v340_v39 }
  0x57   :  { %574 = vmatprep.subr.bf16.mxu0 %v573_v41 }
  0x58   :  { %576 = vmatpush3.bf16.msra.mxu0 %v575_v44 }
  0xed   :  { %v138_v24 = vpop.f32.mrb[0].mxu0 }
  0xee   :  { %v139_v25 = vadd.f32 %v138_v24, %v51_v22  ;;  %v140_v26 = vpop.f32.mrb[1].mxu0 }
  0xef   :  { %v141_v27 = vadd.f32 %v140_v26, %v55_v23 }
  0xf0   :  { %v149_v30 = vmax.f32 %v139_v25, 0.0 }
  0xf1   :  { %v144_v28 = vpop.f32.mrb[2].mxu0  ;;  %v150_v29 = vmax.f32 %v141_v27, 0.0 }
  0xf2   :  { %v145_v31 = vadd.f32 %v144_v28, %v51_v22  ;;  %v146_v32 = vpop.f32.mrb[3].mxu0 }
  0xf3   :  { %v147_v33 = vadd.f32 %v146_v32, %v55_v23  ;;  %293 = vmatprep.mubr.f32.mxu1 %v150_v29 }
  0xf4   :  { %294 = vmatmul.mubr.f32.vlgmr.msra.gmra.mrb[0].mxu1 %v149_v30  ;;  %v151_v35 = vmax.f32 %v145_v31, 0.0 }
  0xf5   :  { %v152_v34 = vmax.f32 %v147_v33, 0.0 }
  0xf7   :  { %299 = vmatprep.mubr.f32.mxu1 %v152_v34 }
  0xf8   :  { %300 = vmatmul.mubr.f32.gmra.mrb[2].mxu1 %v151_v35 }
 0x1c7   :  { %v295_v48 = vpop.f32.mrb[0].mxu1 }
 0x1c8   :  { %v296_v49 = vadd.f32 %v295_v48, %v222_v46  ;;  %v297_v50 = vpop.f32.mrb[1].mxu1 }
 0x1c9   :  { %v298_v51 = vadd.f32 %v297_v50, %v226_v47 }
 0x1ca   :  { %v306_v54 = vmax.f32 %v296_v49, 0.0 }
 0x1cb   :  { %v307_v52 = vmax.f32 %v298_v51, 0.0  ;;  %v301_v53 = vpop.f32.mrb[2].mxu1 }
 0x1cc   :  { %v302_v55 = vadd.f32 %v301_v53, %v222_v46  ;;  %v303_v56 = vpop.f32.mrb[3].mxu1 }
 0x1cd   :  { %v304_v57 = vadd.f32 %v303_v56, %v226_v47  ;;  %413 = vmatprep.mubr.f32.mxu0 %v307_v52 }
 0x1ce   :  { %414 = vmatmul.mubr.f32.vlgmr.msra.gmra.mrb[4].mxu0 %v306_v54  ;;  %v308_v59 = vmax.f32 %v302_v55, 0.0 }
 0x1cf   :  { %v309_v58 = vmax.f32 %v304_v57, 0.0 }
 0x1d1   :  { %418 = vmatprep.mubr.f32.mxu0 %v309_v58 }
 0x1d2   :  { %419 = vmatmul.mubr.f32.gmra.mrb[6].mxu0 %v308_v59 }
 0x2a1   :  { %v469_v60 = vpop.f32.mrb[4].mxu0 }
 0x2a2   :  { %v470_v62 = vpop.f32.mrb[5].mxu0 }
 0x2a3   :  { %v471_v63 = vadd.f32 %v470_v62, %v469_v60 }
 0x2a5   :  { %v416_v0 = vadd.f32 %v471_v63, %v436_v61  ;;  %v472_v1 = vpop.f32.mrb[6].mxu0 }
 0x2a6   :  { %v473_v2 = vpop.f32.mrb[7].mxu0 }
 0x2a7   :  { %425 = vst.msk [vmem:[%s809_s7] sm:$0xff] %vm424_vm4, %v416_v0  ;;  %v474_v3 = vadd.f32 %v473_v2, %v472_v1 }
 0x2a9   :  { %v421_v4 = vadd.f32 %v474_v3, %v436_v61 }
 0x2ab   :  { %426 = vst.msk [vmem:[%s809_s7 + $0x8] sm:$0xff] %vm424_vm4, %v421_v4 }
 0x2ac   :  { %431 = vsyncpa [#allocation3], 1 }

</bundles_post_ra>
